<compile_context>
chip_gen: v7x
topology: tpu7x:2x2x1
jax: 0.10.0
libtpu: 0.0.40
codegen_flags: <defaults>
</compile_context>

<pallas_src>
import numpy as np

import jax
import jax.numpy as jnp
from jax.experimental import pallas as pl
from jax.experimental.pallas import tpu as pltpu


def convert_to_coarse_mask(mask, dim):
    """Minimal stand-in for NNI's convert_to_coarse_mask.

    Returns (removed_channel_indices, remained_channel_indices) along `dim`.
    A channel is 'remained' if any element of its mask slice is nonzero.
    Returned as numpy arrays - the masks are concrete at module-construction
    time in the NNI speedup use-case, so channel bookkeeping is static.
    """
    m = np.asarray(mask)
    other = tuple(i for i in range(m.ndim) if i != dim)
    per_channel = np.abs(m).sum(axis=other)
    remained = np.nonzero(per_channel > 0)[0].astype(np.int32)
    removed = np.nonzero(per_channel == 0)[0].astype(np.int32)
    return removed, remained


def _build_runs(channels_a, channels_b, channels_out, c_full):
    """Static schedule: contiguous runs of output channels sharing one source
    pattern. Each run is (out_start, length, a_start, b_start); -1 means
    'not present in that input'."""
    ca = np.asarray(channels_a, dtype=np.int64).ravel()
    cb = np.asarray(channels_b, dtype=np.int64).ravel()
    co = np.asarray(channels_out, dtype=np.int64).ravel()
    pos_a = np.full((c_full,), -1, np.int64)
    pos_a[ca] = np.arange(ca.size)
    pos_b = np.full((c_full,), -1, np.int64)
    pos_b[cb] = np.arange(cb.size)
    sa = pos_a[co]
    sb = pos_b[co]

    runs = []
    j = 0
    while j < co.size:
        a0, b0 = int(sa[j]), int(sb[j])
        length = 1
        k = j + 1
        while k < co.size:
            ok_a = (sa[k] == a0 + length) if a0 >= 0 else (sa[k] < 0)
            ok_b = (sb[k] == b0 + length) if b0 >= 0 else (sb[k] < 0)
            if not (ok_a and ok_b):
                break
            length += 1
            k += 1
        runs.append((j, length, a0, b0))
        j = k
    return runs


def _make_kernel(runs, out_dtype, have_a, have_b):
    """Kernel over blocks of shape (bn, C, hw_tile): static unroll over
    contiguous channel runs. No dynamic gather, no multiply-by-zero gating
    (NaN-safe), operands that feed no output channel are not even arguments."""

    def kernel(*refs):
        i = 0
        a_ref = None
        b_ref = None
        if have_a:
            a_ref = refs[i]
            i += 1
        if have_b:
            b_ref = refs[i]
            i += 1
        o_ref = refs[i]

        for (o0, ln, a0, b0) in runs:
            if a0 >= 0 and b0 >= 0:
                o_ref[:, o0:o0 + ln, :] = (
                    a_ref[:, a0:a0 + ln, :].astype(out_dtype)
                    + b_ref[:, b0:b0 + ln, :].astype(out_dtype))
            elif a0 >= 0:
                o_ref[:, o0:o0 + ln, :] = a_ref[:, a0:a0 + ln, :].astype(out_dtype)
            elif b0 >= 0:
                o_ref[:, o0:o0 + ln, :] = b_ref[:, b0:b0 + ln, :].astype(out_dtype)
            else:
                o_ref[:, o0:o0 + ln, :] = jnp.zeros(
                    (o_ref.shape[0], ln, o_ref.shape[2]), out_dtype)

    return kernel


def _vmem_capacity_bytes():
    """Physical per-core VMEM (generation-aware) with a conservative fallback."""
    try:
        info = pltpu.get_tpu_info()
        cap = int(getattr(info, "vmem_capacity_bytes", 0) or 0)
        if cap >= (32 << 20):
            return cap
    except Exception:
        pass
    return 64 << 20  # assume the smallest current generation (v7x: 64 MiB)


def _round_up(x, m):
    return -(-int(x) // int(m)) * int(m)


def _sublane_rows(itemsize):
    # minimal sublane tile: 8 rows for 32-bit, 16 for bf16, 32 for 8-bit
    return 8 * max(1, 4 // max(1, int(itemsize)))


def add_operation(a, b, channels_a, channels_b, channels_out, original_size):
    """Pallas implementation of AddOperation.forward.

    a: (N, len(channels_a), H, W)
    b: (N, len(channels_b), H, W)
    returns: (N, len(channels_out), H, W), dtype = a.dtype
    """
    c_full, H, W = (int(s) for s in original_size)
    N = int(a.shape[0])
    HW = H * W
    channels_a = np.asarray(channels_a)
    channels_b = np.asarray(channels_b)
    channels_out = np.asarray(channels_out)
    c_a = int(a.shape[1])
    c_b = int(b.shape[1])
    c_out = int(channels_out.size)
    out_dtype = a.dtype

    if N == 0 or c_out == 0 or HW == 0:
        return jnp.zeros((N, c_out, H, W), out_dtype)

    runs = _build_runs(channels_a, channels_b, channels_out, c_full)
    have_a = c_a > 0 and any(r[2] >= 0 for r in runs)
    have_b = c_b > 0 and any(r[3] >= 0 for r in runs)
    if not have_a and not have_b:
        # no surviving output channel is fed by either input
        return jnp.zeros((N, c_out, H, W), out_dtype)

    # Free reshapes (merge contiguous trailing dims): no pad, no extra HBM pass.
    a3 = a.reshape(N, c_a, HW) if have_a else None
    b3 = b.reshape(N, c_b, HW) if have_b else None

    isa = jnp.dtype(a.dtype).itemsize
    isb = jnp.dtype(b.dtype).itemsize
    iso = jnp.dtype(out_dtype).itemsize

    def slab_bytes(c, itemsize, hw):
        # VMEM footprint of one (1, c, hw) block: channels pad to the sublane
        # tile, spatial pads to whole 128-lane tiles.
        if c == 0:
            return 0
        return _round_up(c, _sublane_rows(itemsize)) * _round_up(hw, 128) * itemsize

    def step_cost(bn_, hw_):
        return bn_ * ((slab_bytes(c_a, isa, hw_) if have_a else 0)
                      + (slab_bytes(c_b, isb, hw_) if have_b else 0)
                      + slab_bytes(c_out, iso, hw_))

    # ---- generation-aware step sizing --------------------------------------
    cap = _vmem_capacity_bytes()                  # 64 MiB (v7x) / 128 MiB (v5e/v6e)
    budget = min(cap * 5 // 8, cap - (8 << 20))   # ~40 MiB / ~80 MiB usable
    target_step_bytes = budget // 4               # ~10 MiB / ~20 MiB per grid step

    per_batch_bytes = step_cost(1, HW)

    if per_batch_bytes <= target_step_bytes:
        # Whole spatial extent per step; group batches.  Each block is bn fully
        # contiguous per-batch slabs in HBM (maximal DMA contiguity).
        hw_tile = HW
        bn = max(1, min(N, target_step_bytes // max(per_batch_bytes, 1)))
        if N >= 2 and pl.cdiv(N, bn) < 2:
            bn = pl.cdiv(N, 2)            # keep >=2 steps so both v7x TCs work
    else:
        # Split the flat spatial axis; per-(n, c) HBM chunk = hw_tile*itemsize.
        bn = 1
        if HW <= 128:
            hw_tile = HW                  # full extent (always a legal block dim)
        else:
            per_row = step_cost(1, 128)   # bytes per 128-lane spatial slice
            hw_tile = (target_step_bytes // max(per_row, 1)) * 128
            chunk_floor = _round_up(16384 // min(isa, isb, iso), 128)
            hw_tile = max(hw_tile, chunk_floor)           # >=16 KiB per (n,c) chunk
            max_by_budget = ((budget - (2 << 20)) // 2 // max(per_row, 1)) * 128
            hw_tile = min(hw_tile, max(128, max_by_budget))
            hw_tile = min(hw_tile, _round_up(HW, 128))
            if hw_tile >= HW:
                hw_tile = HW

    # If the grid collapsed to a single step, split spatially so the second
    # v7x TensorCore gets work (harmless on single-core v5e/v6e).
    if pl.cdiv(N, bn) * pl.cdiv(HW, hw_tile) < 2 and hw_tile == HW and HW > 128:
        half = _round_up(pl.cdiv(HW, 2), 128)
        if half < HW:
            hw_tile = half

    bn = int(bn)
    hw_tile = int(hw_tile)
    n_grid = int(pl.cdiv(N, bn))
    s_grid = int(pl.cdiv(HW, hw_tile))

    step_bytes = step_cost(bn, hw_tile)
    need = 2 * step_bytes + (2 << 20)             # double-buffered blocks + slack
    if need > cap - (4 << 20):
        # TODO(synk): add a channel-run grid split for the (unrealistic) case
        # where one 128-lane spatial slice of all channels cannot fit in VMEM.
        raise NotImplementedError(
            f"AddOperation step ({step_bytes} B) does not fit VMEM ({cap} B)")
    vmem_limit = int(min(cap - (4 << 20), max(need, min(16 << 20, cap // 4))))

    idx_map = lambda n, s: (n, 0, s)
    operands, in_specs = [], []
    if have_a:
        operands.append(a3)
        in_specs.append(pl.BlockSpec((bn, c_a, hw_tile), idx_map))
    if have_b:
        operands.append(b3)
        in_specs.append(pl.BlockSpec((bn, c_b, hw_tile), idx_map))

    grid_spec = pltpu.PrefetchScalarGridSpec(
        num_scalar_prefetch=0,
        grid=(n_grid, s_grid),
        in_specs=in_specs,
        out_specs=pl.BlockSpec((bn, c_out, hw_tile), idx_map))

    out3 = pl.pallas_call(
        _make_kernel(runs, out_dtype, have_a, have_b),
        out_shape=jax.ShapeDtypeStruct((N, c_out, HW), out_dtype),
        grid_spec=grid_spec,
        compiler_params=pltpu.CompilerParams(
            dimension_semantics=("parallel", "parallel"),
            vmem_limit_bytes=vmem_limit),
    )(*operands)

    return out3.reshape(N, c_out, H, W)


def add_operation_ref(a, b, channels_a, channels_b, channels_out, original_size):
    """Pure-JAX reference mirroring the PyTorch forward exactly."""
    N = a.shape[0]
    buf = jnp.zeros((N,) + tuple(int(s) for s in original_size), dtype=a.dtype)
    buf = buf.at[:, np.asarray(channels_a)].set(a)
    buf = buf.at[:, np.asarray(channels_b)].add(b)
    return buf[:, np.asarray(channels_out)]


if __name__ == "__main__":
    key = jax.random.PRNGKey(0)
    k1, k2, k3, k4 = jax.random.split(key, 4)

    # ---- Test 1: mismatched masks (exercises the per-run scatter/add) ------
    N, C_full, H, W = 2, 8, 16, 16
    original_size = (C_full, H, W)
    keep_a = np.array([1, 0, 1, 1, 0, 1, 0, 0], np.float32)   # a:   0,2,3,5
    keep_b = np.array([0, 1, 1, 0, 0, 1, 1, 1], np.float32)   # b:   1,2,5,6,7
    keep_o = np.array([1, 1, 1, 0, 1, 1, 0, 1], np.float32)   # out: 0,1,2,4,5,7
    mask_a = np.broadcast_to(keep_a[None, :, None, None], (1, C_full, H, W))
    mask_b = np.broadcast_to(keep_b[None, :, None, None], (1, C_full, H, W))
    mask_o = np.broadcast_to(keep_o[None, :, None, None], (1, C_full, H, W))
    channels_a = convert_to_coarse_mask(mask_a, 1)[1]
    channels_b = convert_to_coarse_mask(mask_b, 1)[1]
    channels_out = convert_to_coarse_mask(mask_o, 1)[1]

    a = jax.random.normal(k1, (N, int(channels_a.size), H, W), jnp.float32)
    b = jax.random.normal(k2, (N, int(channels_b.size), H, W), jnp.float32)
    # Channel 3 is in channels_a but NOT in channels_out: poison it with NaN to
    # verify dead input channels never propagate (no multiply-by-zero gating).
    idx_unused = int(np.nonzero(channels_a == 3)[0][0])
    a = a.at[:, idx_unused].set(jnp.nan)

    out = jax.block_until_ready(
        add_operation(a, b, channels_a, channels_b, channels_out, original_size))
    ref = add_operation_ref(a, b, channels_a, channels_b, channels_out,
                            original_size)
    assert out.shape == ref.shape, (out.shape, ref.shape)
    assert bool(jnp.all(jnp.isfinite(out))), "NaN leaked from unused channel"
    assert jnp.allclose(out, ref, atol=1e-6), "test 1: mismatch vs reference"

    # ---- Test 2: identical masks (common residual-add case), odd spatial ---
    # size (14x14 -> flat 196, not a multiple of 128) and a batch count that
    # does not divide the batch tile, exercising the ragged grid edges the
    # kernel now relies on instead of XLA-side pad/crop.
    N2, C2, H2, W2 = 3, 5, 14, 14
    ones = np.ones((1, C2, H2, W2), np.float32)
    ch = convert_to_coarse_mask(ones, 1)[1]
    a2 = jax.random.normal(k3, (N2, C2, H2, W2), jnp.float32)
    b2 = jax.random.normal(k4, (N2, C2, H2, W2), jnp.float32)
    out2 = jax.block_until_ready(
        add_operation(a2, b2, ch, ch, ch, (C2, H2, W2)))
    ref2 = add_operation_ref(a2, b2, ch, ch, ch, (C2, H2, W2))
    assert out2.shape == ref2.shape, (out2.shape, ref2.shape)
    assert jnp.allclose(out2, ref2, atol=1e-6), "test 2: mismatch vs reference"

    print("KERNEL_OK")
</pallas_src>

<mosaic_0001>
module attributes {stable_mosaic.version = 11 : i64} {
  func.func @kernel(%arg0: i32, %arg1: i32, %arg2: memref<1x4x256xf32, #tpu.memory_space<vmem>>, %arg3: memref<1x5x256xf32, #tpu.memory_space<vmem>>, %arg4: memref<1x6x256xf32, #tpu.memory_space<vmem>>) attributes {dimension_semantics = [#tpu.dimension_semantics<parallel>, #tpu.dimension_semantics<parallel>], iteration_bounds = array<i64: 2, 1>, scalar_prefetch = 0 : i64, scratch_operands = 0 : i64, tpu.core_type = #tpu.core_type<tc>, window_params = [{transform_indices = @transform_0, window_bounds = array<i64: 1, 4, 256>}, {transform_indices = @transform_1, window_bounds = array<i64: 1, 5, 256>}, {transform_indices = @transform_2, window_bounds = array<i64: 1, 6, 256>}]} {
    %c0 = arith.constant 0 : index
    %c0_0 = arith.constant 0 : index
    %c0_1 = arith.constant 0 : index
    %0 = vector.load %arg2[%c0, %c0_0, %c0_1] : memref<1x4x256xf32, #tpu.memory_space<vmem>>, vector<1x1x256xf32>
    %c0_2 = arith.constant 0 : index
    %c0_3 = arith.constant 0 : index
    %c0_4 = arith.constant 0 : index
    %1 = vector.load %arg4[%c0_2, %c0_3, %c0_4] : memref<1x6x256xf32, #tpu.memory_space<vmem>>, vector<1x1x256xf32>
    tpu.vector_store %arg4[%c0_2, %c0_3, %c0_4], %0 {strides = array<i32>} : memref<1x6x256xf32, #tpu.memory_space<vmem>>, vector<1x1x256xf32>,
    %c0_5 = arith.constant 0 : index
    %c0_6 = arith.constant 0 : index
    %c0_7 = arith.constant 0 : index
    %2 = vector.load %arg3[%c0_5, %c0_6, %c0_7] : memref<1x5x256xf32, #tpu.memory_space<vmem>>, vector<1x1x256xf32>
    %c0_8 = arith.constant 0 : index
    %c1 = arith.constant 1 : index
    %c0_9 = arith.constant 0 : index
    %3 = vector.load %arg4[%c0_8, %c1, %c0_9] : memref<1x6x256xf32, #tpu.memory_space<vmem>>, vector<1x1x256xf32>
    tpu.vector_store %arg4[%c0_8, %c1, %c0_9], %2 {strides = array<i32>} : memref<1x6x256xf32, #tpu.memory_space<vmem>>, vector<1x1x256xf32>,
    %c0_10 = arith.constant 0 : index
    %c1_11 = arith.constant 1 : index
    %c0_12 = arith.constant 0 : index
    %4 = vector.load %arg2[%c0_10, %c1_11, %c0_12] : memref<1x4x256xf32, #tpu.memory_space<vmem>>, vector<1x1x256xf32>
    %c0_13 = arith.constant 0 : index
    %c1_14 = arith.constant 1 : index
    %c0_15 = arith.constant 0 : index
    %5 = vector.load %arg3[%c0_13, %c1_14, %c0_15] : memref<1x5x256xf32, #tpu.memory_space<vmem>>, vector<1x1x256xf32>
    %6 = arith.addf %4, %5 : vector<1x1x256xf32>
    %c0_16 = arith.constant 0 : index
    %c2 = arith.constant 2 : index
    %c0_17 = arith.constant 0 : index
    %7 = vector.load %arg4[%c0_16, %c2, %c0_17] : memref<1x6x256xf32, #tpu.memory_space<vmem>>, vector<1x1x256xf32>
    tpu.vector_store %arg4[%c0_16, %c2, %c0_17], %6 {strides = array<i32>} : memref<1x6x256xf32, #tpu.memory_space<vmem>>, vector<1x1x256xf32>,
    %cst = arith.constant 0.000000e+00 : f32
    %8 = vector.broadcast %cst : f32 to vector<1x1x256xf32>
    %c0_18 = arith.constant 0 : index
    %c3 = arith.constant 3 : index
    %c0_19 = arith.constant 0 : index
    %9 = vector.load %arg4[%c0_18, %c3, %c0_19] : memref<1x6x256xf32, #tpu.memory_space<vmem>>, vector<1x1x256xf32>
    tpu.vector_store %arg4[%c0_18, %c3, %c0_19], %8 {strides = array<i32>} : memref<1x6x256xf32, #tpu.memory_space<vmem>>, vector<1x1x256xf32>,
    %c0_20 = arith.constant 0 : index
    %c3_21 = arith.constant 3 : index
    %c0_22 = arith.constant 0 : index
    %10 = vector.load %arg2[%c0_20, %c3_21, %c0_22] : memref<1x4x256xf32, #tpu.memory_space<vmem>>, vector<1x1x256xf32>
    %c0_23 = arith.constant 0 : index
    %c2_24 = arith.constant 2 : index
    %c0_25 = arith.constant 0 : index
    %11 = vector.load %arg3[%c0_23, %c2_24, %c0_25] : memref<1x5x256xf32, #tpu.memory_space<vmem>>, vector<1x1x256xf32>
    %12 = arith.addf %10, %11 : vector<1x1x256xf32>
    %c0_26 = arith.constant 0 : index
    %c4 = arith.constant 4 : index
    %c0_27 = arith.constant 0 : index
    %13 = vector.load %arg4[%c0_26, %c4, %c0_27] : memref<1x6x256xf32, #tpu.memory_space<vmem>>, vector<1x1x256xf32>
    tpu.vector_store %arg4[%c0_26, %c4, %c0_27], %12 {strides = array<i32>} : memref<1x6x256xf32, #tpu.memory_space<vmem>>, vector<1x1x256xf32>,
    %c0_28 = arith.constant 0 : index
    %c4_29 = arith.constant 4 : index
    %c0_30 = arith.constant 0 : index
    %14 = vector.load %arg3[%c0_28, %c4_29, %c0_30] : memref<1x5x256xf32, #tpu.memory_space<vmem>>, vector<1x1x256xf32>
    %c0_31 = arith.constant 0 : index
    %c5 = arith.constant 5 : index
    %c0_32 = arith.constant 0 : index
    %15 = vector.load %arg4[%c0_31, %c5, %c0_32] : memref<1x6x256xf32, #tpu.memory_space<vmem>>, vector<1x1x256xf32>
    tpu.vector_store %arg4[%c0_31, %c5, %c0_32], %14 {strides = array<i32>} : memref<1x6x256xf32, #tpu.memory_space<vmem>>, vector<1x1x256xf32>,
    return
  }
  func.func @transform_0(%arg0: i32, %arg1: i32) -> (i32, i32, i32) {
    %c0_i32 = arith.constant 0 : i32
    %c0_i32_0 = arith.constant 0 : i32
    return %arg0, %c0_i32, %arg1 : i32, i32, i32
  }
  func.func @transform_1(%arg0: i32, %arg1: i32) -> (i32, i32, i32) {
    %c0_i32 = arith.constant 0 : i32
    %c0_i32_0 = arith.constant 0 : i32
    return %arg0, %c0_i32, %arg1 : i32, i32, i32
  }
  func.func @transform_2(%arg0: i32, %arg1: i32) -> (i32, i32, i32) {
    %c0_i32 = arith.constant 0 : i32
    %c0_i32_0 = arith.constant 0 : i32
    return %arg0, %c0_i32, %arg1 : i32, i32, i32
  }
}

</mosaic_0001>

<bundles_post_ra>
// kernel: tpu_custom_call.1
= control target key start
LH: loop header
LB: loop body
LE: loop exit
PB: predicated region body
PF: predicated region fallthrough
CT: control target
= control target key end

     0   :  { %s450_s9 = smov 0   ;;  %s452_s10 = smov 0   ;;  %s502_s0 = inlined_call_operand.vmem [shape: f32[2,4,256], index: 0, kind: input, shape index: {}]   ;;  %s503_s1 = inlined_call_operand.vmem [shape: f32[2,5,256], index: 1, kind: input, shape index: {}]   ;;  %s504_s2 = inlined_call_operand.vmem [shape: f32[2,6,256], index: 2, kind: output, shape index: {}]  }
   0x1   :  { %s454_s11 = smov 0  }
   0x2 LB: > { %s24_s12 = sadd.s32 1, %s428_s10  ;;  %p363_p0 = scmp.ge.s32.totalorder %s432_s11, 1  ;;  %s432_s11 = sphi %s454_s11, %s12_s11   ;;  %s428_s10 = sphi %s452_s10, %s508_s10   ;;  %s424_s9 = sphi %s450_s9, %s507_s9  }
   0x3   : > { %p26_p1 = scmp.ge.s32.totalorder %s24_s12, 2  ;;  %p150_p2 = scmp.lt.s32.totalorder %s432_s11, 3 }
   0x5   : > { %s510_s12 = smov (%p26_p1, %s24_s12), 0  ;;  %p151_p3 = pnand %p363_p0, %p150_p2 }
   0x6   : > { %p190_p4 = scmp.lt.s32.totalorder (!%p151_p3), %s424_s9, 1  ;;  %v220_v0 = vlaneseq (!%p151_p3)  ;;  %v434_v4 = vmov (!%p151_p3), 0.0  }
   0x7   : > { %154 = sbr.rel (%p151_p3) target bundleno = 25 (0x19), region = 28 }
   0x8   : > { %vm468_vm0 = vcmp.lt.s32.totalorder (!%p151_p3), %v220_v0, 256 }
   0xe   : > { %s512_s9 = smov (!%p190_p4, %s424_s9), 1 }
   0xf   : > { %s382_s13 = sshll.u32 %s512_s9, 3  ;;  %s383_s14 = sshll.u32 %s512_s9, 4 }
  0x10   : > { %s197_s17 = scalar_lea.vmem %s502_s0, %s382_s13  ;;  %s217_s20 = scalar_lea.vmem %s504_s2, %s383_s14 }
  0x11   : > { %v219_v2 = vld [vmem:[%s197_s17] ss:$4 sm:$0x3]  ;;  %s207_s23 = scalar_lea.vmem %s503_s1, %s383_s14  ;;  %v371_v3 = vld [vmem:[%s197_s17 + $0x1] ss:$4 sm:$0x3] }
  0x12   : > { %374 = vst.msk [vmem:[%s217_s20 + $0x3] ss:$8 sm:$0x3] %vm468_vm0, %v434_v4  ;;  %224 = vst.msk [vmem:[%s217_s20] ss:$8 sm:$0x3] %vm468_vm0, %v219_v2 }
  0x13   : > { %v226_v5 = vld [vmem:[%s207_s23] ss:$8 sm:$0x3]  ;;  %v372_v6 = vld [vmem:[%s207_s23 + $0x1] ss:$8 sm:$0x3] }
  0x14   : > { %370 = vst.msk [vmem:[%s217_s20 + $0x1] ss:$8 sm:$0x3] %vm468_vm0, %v226_v5  ;;  %v234_v7 = vadd.f32 %v372_v6, %v371_v3  ;;  %v375_v8 = vld [vmem:[%s197_s17 + $0x3] ss:$4 sm:$0x3] }
  0x15   : > { %v376_v9 = vld [vmem:[%s207_s23 + $0x2] ss:$8 sm:$0x3]  ;;  %v378_v11 = vld [vmem:[%s207_s23 + $0x4] ss:$8 sm:$0x3] }
  0x16   : > { %v245_v10 = vadd.f32 %v376_v9, %v375_v8  ;;  %373 = vst.msk [vmem:[%s217_s20 + $0x2] ss:$8 sm:$0x3] %vm468_vm0, %v234_v7  ;;  %379 = vst.msk [vmem:[%s217_s20 + $0x5] ss:$8 sm:$0x3] %vm468_vm0, %v378_v11 }
  0x18   : > { %377 = vst.msk [vmem:[%s217_s20 + $0x4] ss:$8 sm:$0x3] %vm468_vm0, %v245_v10 }
  0x19 PF: > { %s12_s11 = sadd.s32 1, %s432_s11   ;;  %s507_s9 = smov %s428_s10 }
  0x1a   : > { %p9_p5 = scmp.ge.s32.totalorder %s12_s11, 4   ;;  %s508_s10 = smov %s510_s12 }
  0x1c   :  { %11 = sbr.rel (!%p9_p5) target bundleno = 2 (0x2), region = 71 }

</bundles_post_ra>
